<compile_context>
chip_gen: v7x
topology: tpu7x:2x2x1
jax: 0.10.0
libtpu: 0.0.40
codegen_flags: <defaults>
</compile_context>

<pallas_src>
import math
import functools

import jax
import jax.numpy as jnp
from jax.experimental import pallas as pl
from jax.experimental.pallas import tpu as pltpu


# --------------------------------------------------------------------------
# Kernel: one (hidden-tile, batch-tile) block of the LSTM cell.
# Packed gate order per hidden tile is [i, f, o, g] -> one wide sigmoid over
# 3*th contiguous lanes and one tanh over th lanes (clean EUP stream).
# --------------------------------------------------------------------------
def lstm_cell_kernel(x_ref, hx_ref, cx_ref, w_ih_ref, w_hh_ref, b_ref,
                     hy_ref, cy_ref, *, precision):
    wdt = w_ih_ref.dtype
    # Two MXU contractions; x/hx arrive untouched from HBM (no host concat).
    gates = jnp.dot(x_ref[...].astype(wdt), w_ih_ref[...],
                    preferred_element_type=jnp.float32, precision=precision)
    gates = gates + jnp.dot(hx_ref[...].astype(wdt), w_hh_ref[...],
                            preferred_element_type=jnp.float32,
                            precision=precision)
    gates = gates + b_ref[...]                       # (1, 4*th) f32 fused bias

    th = hy_ref.shape[-1]
    sig = jax.nn.sigmoid(gates[:, : 3 * th])         # [i | f | o] in one pass
    ingate = sig[:, 0 * th:1 * th]
    forgetgate = sig[:, 1 * th:2 * th]
    outgate = sig[:, 2 * th:3 * th]
    cellgate = jnp.tanh(gates[:, 3 * th:4 * th])     # g

    cx = cx_ref[...].astype(jnp.float32)
    cy = forgetgate * cx + ingate * cellgate
    hy = outgate * jnp.tanh(cy)

    hy_ref[...] = hy.astype(hy_ref.dtype)
    cy_ref[...] = cy.astype(cy_ref.dtype)


# --------------------------------------------------------------------------
# One-time parameter packing (hoisted out of the per-step path)
# --------------------------------------------------------------------------
def _choose_hidden_tile(input_size, hidden_size, w_itemsize,
                        weight_block_budget=24 << 20):
    """Largest hidden tile th (multiple of 128 dividing H) whose weight block
    (I+H)*4*th fits the budget.  Irregular H -> single tile of width H."""
    H, I = hidden_size, input_size
    if H % 128 != 0:
        # TODO(synk): pad H to a multiple of 128 for lane-dense tiles/stores.
        return H
    candidates = sorted({H // n for n in range(1, H // 128 + 1)
                         if H % n == 0 and (H // n) % 128 == 0}, reverse=True)
    for th in candidates:
        if (I + H) * 4 * th * w_itemsize <= weight_block_budget:
            return th
    return candidates[-1] if candidates else H


def _pack_gate_cols(a, hidden_size, th):
    """Reorder last axis (4H, torch gate order [i,f,g,o]) so each hidden tile j
    has its four gates contiguous: [... | i_j | f_j | o_j | g_j | ...]."""
    H = hidden_size
    n_t = H // th
    lead = a.shape[:-1]
    a = a.reshape(lead + (4, n_t, th))
    a = jnp.take(a, jnp.array([0, 1, 3, 2]), axis=-3)   # -> [i, f, o, g]
    a = jnp.swapaxes(a, -3, -2)                         # (..., n_t, 4, th)
    return a.reshape(lead + (4 * H,))


def pack_lstm_params(weight_ih, weight_hh, bias_ih, bias_hh,
                     compute_dtype=None, hidden_tile=None):
    """Returns (w_ih_p, w_hh_p, b_p, th).
    w_ih_p: (I, 4H), w_hh_p: (H, 4H) with per-hidden-tile gate groups [i|f|o|g];
    b_p: (1, 4H) fused bias in f32 (tiny deviation from torch if params are
    low precision and torch adds biases in that precision); th: tile width.
    compute_dtype=jnp.bfloat16 halves weight HBM/VMEM traffic (recommended in
    production; f32 accumulation on the MXU either way)."""
    H4, _I = weight_ih.shape
    H = H4 // 4
    I = weight_ih.shape[1]
    dt = compute_dtype if compute_dtype is not None else weight_ih.dtype
    w_itemsize = jnp.dtype(dt).itemsize
    th = hidden_tile if hidden_tile is not None else _choose_hidden_tile(
        I, H, w_itemsize)

    w_ih_p = _pack_gate_cols(jnp.transpose(weight_ih), H, th).astype(dt)
    w_hh_p = _pack_gate_cols(jnp.transpose(weight_hh), H, th).astype(dt)
    b = bias_ih.astype(jnp.float32) + bias_hh.astype(jnp.float32)
    b_p = _pack_gate_cols(b, H, th).reshape(1, 4 * H)
    return w_ih_p, w_hh_p, b_p, th


# --------------------------------------------------------------------------
# Tiling / VMEM helpers
# --------------------------------------------------------------------------
def _pick_batch_tile(B):
    """>= 2 (ideally 4) batch blocks when B >= 16 so both v7x TensorCores get
    work and DMA overlaps compute; tiles capped at 256 rows (v5e MXU is fed
    fine by <= 256-row LHS tiles)."""
    if B % 8 != 0 or B < 16:
        # TODO(synk): pad B to a multiple of 8 for large irregular batches.
        return B
    target = min(256, max(8, B // 4))
    for cand in (256, 128, 64, 32, 16, 8):
        if cand <= target and B % cand == 0:
            return cand
    return B


def _vmem_cap_bytes():
    try:
        phys = pltpu.get_tpu_info().vmem_capacity_bytes
    except Exception:
        phys = 64 << 20          # conservative (v7x per-TC) if query fails
    return int(phys * 0.85)


# --------------------------------------------------------------------------
# Wrapper (packed-parameter fast path)
# --------------------------------------------------------------------------
def lstm_cell_packed(x, hx, cx, w_ih_p, w_hh_p, b_p, *, hidden_tile=None):
    """x: (B, I); hx, cx: (B, H); packed params from pack_lstm_params."""
    B, I = x.shape
    H = hx.shape[1]
    assert w_ih_p.shape == (I, 4 * H)
    assert w_hh_p.shape == (H, 4 * H)
    assert b_p.shape == (1, 4 * H)
    th = hidden_tile if hidden_tile is not None else H
    assert H % th == 0
    n_h = H // th

    in_itm = jnp.dtype(x.dtype).itemsize
    st_itm = jnp.dtype(cx.dtype).itemsize
    w_itm = jnp.dtype(w_ih_p.dtype).itemsize
    out_itm = jnp.dtype(x.dtype).itemsize

    # Weight/bias blocks: constant block index across batch -> single-buffered.
    w_bufs = 1 if n_h == 1 else 2
    w_mode = pl.Buffered(1) if n_h == 1 else None

    def block_bytes(tb):
        return (2 * tb * I * in_itm              # x tiles (double-buffered)
                + 2 * tb * H * in_itm            # hx tiles
                + 2 * tb * th * st_itm           # cx tiles
                + w_bufs * I * 4 * th * w_itm    # w_ih block
                + w_bufs * H * 4 * th * w_itm    # w_hh block
                + w_bufs * 4 * th * 4            # fused f32 bias block
                + 2 * 2 * tb * th * out_itm      # hy / cy tiles
                + 4 * tb * 4 * th * 4)           # f32 gate temporaries

    cap = _vmem_cap_bytes()
    tb = _pick_batch_tile(B)
    # Degrade gracefully (shrink the batch tile) rather than silently clamping
    # the VMEM limit below the real footprint.
    while (block_bytes(tb) > cap and tb >= 16 and tb % 2 == 0
           and B % (tb // 2) == 0 and (tb // 2) % 8 == 0):
        tb //= 2
    n_b = B // tb

    vmem_limit = int(min(max(block_bytes(tb) + (4 << 20), 32 << 20), cap))

    cost = pl.CostEstimate(
        flops=2 * B * (I + H) * 4 * H,
        transcendentals=5 * B * H,
        bytes_accessed=int(B * (I + H) * in_itm + B * H * st_itm
                           + (I + H) * 4 * H * w_itm + 4 * H * 4
                           + 2 * B * H * out_itm),
    )

    grid_spec = pltpu.PrefetchScalarGridSpec(
        num_scalar_prefetch=0,
        # hidden-tile axis OUTER so the weight block stays resident across all
        # batch blocks; both axes independent -> both "parallel".
        grid=(n_h, n_b),
        in_specs=[
            pl.BlockSpec((tb, I), lambda j, i: (i, 0)),                 # x
            pl.BlockSpec((tb, H), lambda j, i: (i, 0)),                 # hx
            pl.BlockSpec((tb, th), lambda j, i: (i, j)),                # cx
            pl.BlockSpec((I, 4 * th), lambda j, i: (0, j),
                         pipeline_mode=w_mode),                         # W_ih
            pl.BlockSpec((H, 4 * th), lambda j, i: (0, j),
                         pipeline_mode=w_mode),                         # W_hh
            pl.BlockSpec((1, 4 * th), lambda j, i: (0, j),
                         pipeline_mode=w_mode),                         # bias
        ],
        out_specs=(
            pl.BlockSpec((tb, th), lambda j, i: (i, j)),                # hy
            pl.BlockSpec((tb, th), lambda j, i: (i, j)),                # cy
        ),
    )

    precision = (jax.lax.Precision.HIGHEST
                 if jnp.dtype(w_ih_p.dtype) == jnp.float32 else None)
    kernel = functools.partial(lstm_cell_kernel, precision=precision)

    hy, cy = pl.pallas_call(
        kernel,
        out_shape=(jax.ShapeDtypeStruct((B, H), x.dtype),
                   jax.ShapeDtypeStruct((B, H), x.dtype)),
        grid_spec=grid_spec,
        compiler_params=pltpu.CompilerParams(
            dimension_semantics=("parallel", "parallel"),
            vmem_limit_bytes=vmem_limit,
        ),
        cost_estimate=cost,
    )(x, hx, cx, w_ih_p, w_hh_p, b_p)
    return hy, cy


def lstm_cell_nncf(x, hx, cx, weight_ih, weight_hh, bias_ih, bias_hh,
                   compute_dtype=None):
    """Drop-in wrapper matching the PyTorch parameter layout.  For per-timestep
    use, call pack_lstm_params() once and lstm_cell_packed() per step."""
    w_ih_p, w_hh_p, b_p, th = pack_lstm_params(
        weight_ih, weight_hh, bias_ih, bias_hh, compute_dtype=compute_dtype)
    return lstm_cell_packed(x, hx, cx, w_ih_p, w_hh_p, b_p, hidden_tile=th)


# --------------------------------------------------------------------------
# Reference + test
# --------------------------------------------------------------------------
def _reference(x, hx, cx, weight_ih, weight_hh, bias_ih, bias_hh):
    hp = jax.lax.Precision.HIGHEST
    gates = (jnp.dot(x, weight_ih.T, precision=hp) + bias_ih
             + jnp.dot(hx, weight_hh.T, precision=hp) + bias_hh)
    H = hx.shape[1]
    i = jax.nn.sigmoid(gates[:, 0 * H:1 * H])
    f = jax.nn.sigmoid(gates[:, 1 * H:2 * H])
    g = jnp.tanh(gates[:, 2 * H:3 * H])
    o = jax.nn.sigmoid(gates[:, 3 * H:4 * H])
    cy = f * cx + i * g
    hy = o * jnp.tanh(cy)
    return hy, cy


if __name__ == "__main__":
    B, I, H = 2, 16, 32
    key = jax.random.PRNGKey(0)
    kx, kh, kc, k1, k2, k3, k4 = jax.random.split(key, 7)

    # reset_parameters(): uniform(-stdv, stdv), stdv = 1/sqrt(hidden_size).
    stdv = 1.0 / math.sqrt(H)
    weight_ih = jax.random.uniform(k1, (4 * H, I), jnp.float32, -stdv, stdv)
    weight_hh = jax.random.uniform(k2, (4 * H, H), jnp.float32, -stdv, stdv)
    bias_ih = jax.random.uniform(k3, (4 * H,), jnp.float32, -stdv, stdv)
    bias_hh = jax.random.uniform(k4, (4 * H,), jnp.float32, -stdv, stdv)

    x = jax.random.normal(kx, (B, I), jnp.float32)
    hx = jax.random.normal(kh, (B, H), jnp.float32)
    cx = jax.random.normal(kc, (B, H), jnp.float32)

    # One-time parameter packing (hoisted), then the per-step fast path.
    w_ih_p, w_hh_p, b_p, th = pack_lstm_params(weight_ih, weight_hh,
                                               bias_ih, bias_hh)
    jax.block_until_ready((w_ih_p, w_hh_p, b_p))

    step = jax.jit(functools.partial(lstm_cell_packed, hidden_tile=th))
    hy, cy = step(x, hx, cx, w_ih_p, w_hh_p, b_p)
    jax.block_until_ready((hy, cy))

    # Also exercise the drop-in wrapper once.
    hy2, cy2 = lstm_cell_nncf(x, hx, cx, weight_ih, weight_hh,
                              bias_ih, bias_hh)
    jax.block_until_ready((hy2, cy2))

    hy_ref, cy_ref = _reference(x, hx, cx, weight_ih, weight_hh,
                                bias_ih, bias_hh)
    assert jnp.allclose(hy, hy_ref, atol=1e-5, rtol=1e-5)
    assert jnp.allclose(cy, cy_ref, atol=1e-5, rtol=1e-5)
    assert jnp.allclose(hy2, hy_ref, atol=1e-5, rtol=1e-5)
    assert jnp.allclose(cy2, cy_ref, atol=1e-5, rtol=1e-5)

    print("KERNEL_OK")
</pallas_src>

<mosaic_0001>
module attributes {stable_mosaic.version = 11 : i64} {
  func.func @lstm_cell_kernel(%arg0: i32, %arg1: i32, %arg2: memref<2x16xf32, #tpu.memory_space<vmem>>, %arg3: memref<2x32xf32, #tpu.memory_space<vmem>>, %arg4: memref<2x32xf32, #tpu.memory_space<vmem>>, %arg5: memref<16x128xf32, #tpu.memory_space<vmem>>, %arg6: memref<32x128xf32, #tpu.memory_space<vmem>>, %arg7: memref<1x128xf32, #tpu.memory_space<vmem>>, %arg8: memref<2x32xf32, #tpu.memory_space<vmem>>, %arg9: memref<2x32xf32, #tpu.memory_space<vmem>>) attributes {dimension_semantics = [#tpu.dimension_semantics<parallel>, #tpu.dimension_semantics<parallel>], iteration_bounds = array<i64: 1, 1>, scalar_prefetch = 0 : i64, scratch_operands = 0 : i64, tpu.core_type = #tpu.core_type<tc>, window_params = [{transform_indices = @transform_0, window_bounds = array<i64: 2, 16>}, {transform_indices = @transform_1, window_bounds = array<i64: 2, 32>}, {transform_indices = @transform_2, window_bounds = array<i64: 2, 32>}, {pipeline_mode = #tpu.pipeline_mode<synchronous>, transform_indices = @transform_3, window_bounds = array<i64: 16, 128>}, {pipeline_mode = #tpu.pipeline_mode<synchronous>, transform_indices = @transform_4, window_bounds = array<i64: 32, 128>}, {pipeline_mode = #tpu.pipeline_mode<synchronous>, transform_indices = @transform_5, window_bounds = array<i64: 1, 128>}, {transform_indices = @transform_6, window_bounds = array<i64: 2, 32>}, {transform_indices = @transform_7, window_bounds = array<i64: 2, 32>}]} {
    %c0 = arith.constant 0 : index
    %c0_0 = arith.constant 0 : index
    %0 = vector.load %arg2[%c0, %c0_0] : memref<2x16xf32, #tpu.memory_space<vmem>>, vector<2x16xf32>
    %c0_1 = arith.constant 0 : index
    %c0_2 = arith.constant 0 : index
    %1 = vector.load %arg5[%c0_1, %c0_2] : memref<16x128xf32, #tpu.memory_space<vmem>>, vector<16x128xf32>
    %cst = arith.constant dense<0.000000e+00> : vector<2x128xf32>
    %2 = tpu.matmul %0, %1, %cst {dimension_numbers = #tpu.dot_dimension_numbers<[1], [0], [0], [1], [0, 0, 1, 1], [], []>, precision = #tpu.contract_precision<fp32>} : vector<2x16xf32>, vector<16x128xf32>, vector<2x128xf32> -> vector<2x128xf32>
    %c0_3 = arith.constant 0 : index
    %c0_4 = arith.constant 0 : index
    %3 = vector.load %arg3[%c0_3, %c0_4] : memref<2x32xf32, #tpu.memory_space<vmem>>, vector<2x32xf32>
    %c0_5 = arith.constant 0 : index
    %c0_6 = arith.constant 0 : index
    %4 = vector.load %arg6[%c0_5, %c0_6] : memref<32x128xf32, #tpu.memory_space<vmem>>, vector<32x128xf32>
    %cst_7 = arith.constant dense<0.000000e+00> : vector<2x128xf32>
    %5 = tpu.matmul %3, %4, %cst_7 {dimension_numbers = #tpu.dot_dimension_numbers<[1], [0], [0], [1], [0, 0, 1, 1], [], []>, precision = #tpu.contract_precision<fp32>} : vector<2x32xf32>, vector<32x128xf32>, vector<2x128xf32> -> vector<2x128xf32>
    %6 = arith.addf %2, %5 : vector<2x128xf32>
    %c0_8 = arith.constant 0 : index
    %c0_9 = arith.constant 0 : index
    %7 = vector.load %arg7[%c0_8, %c0_9] : memref<1x128xf32, #tpu.memory_space<vmem>>, vector<1x128xf32>
    %8 = vector.broadcast %7 : vector<1x128xf32> to vector<2x128xf32>
    %9 = arith.addf %6, %8 : vector<2x128xf32>
    %10 = vector.extract_strided_slice %9 {offsets = [0, 0], sizes = [2, 96], strides = [1, 1]} : vector<2x128xf32> to vector<2x96xf32>
    %11 = arith.negf %10 : vector<2x96xf32>
    %12 = math.exp %11 : vector<2x96xf32>
    %cst_10 = arith.constant 1.000000e+00 : f32
    %13 = vector.broadcast %cst_10 : f32 to vector<2x96xf32>
    %14 = arith.addf %13, %12 : vector<2x96xf32>
    %15 = arith.divf %13, %14 : vector<2x96xf32>
    %16 = vector.extract_strided_slice %15 {offsets = [0, 0], sizes = [2, 32], strides = [1, 1]} : vector<2x96xf32> to vector<2x32xf32>
    %17 = vector.extract_strided_slice %15 {offsets = [0, 32], sizes = [2, 32], strides = [1, 1]} : vector<2x96xf32> to vector<2x32xf32>
    %18 = vector.extract_strided_slice %15 {offsets = [0, 64], sizes = [2, 32], strides = [1, 1]} : vector<2x96xf32> to vector<2x32xf32>
    %19 = vector.extract_strided_slice %9 {offsets = [0, 96], sizes = [2, 32], strides = [1, 1]} : vector<2x128xf32> to vector<2x32xf32>
    %20 = math.tanh %19 : vector<2x32xf32>
    %c0_11 = arith.constant 0 : index
    %c0_12 = arith.constant 0 : index
    %21 = vector.load %arg4[%c0_11, %c0_12] : memref<2x32xf32, #tpu.memory_space<vmem>>, vector<2x32xf32>
    %22 = arith.mulf %17, %21 : vector<2x32xf32>
    %23 = arith.mulf %16, %20 : vector<2x32xf32>
    %24 = arith.addf %22, %23 : vector<2x32xf32>
    %25 = math.tanh %24 : vector<2x32xf32>
    %26 = arith.mulf %18, %25 : vector<2x32xf32>
    %c0_13 = arith.constant 0 : index
    %c0_14 = arith.constant 0 : index
    %27 = vector.load %arg8[%c0_13, %c0_14] : memref<2x32xf32, #tpu.memory_space<vmem>>, vector<2x32xf32>
    tpu.vector_store %arg8[%c0_13, %c0_14], %26 {strides = array<i32>} : memref<2x32xf32, #tpu.memory_space<vmem>>, vector<2x32xf32>,
    %c0_15 = arith.constant 0 : index
    %c0_16 = arith.constant 0 : index
    %28 = vector.load %arg9[%c0_15, %c0_16] : memref<2x32xf32, #tpu.memory_space<vmem>>, vector<2x32xf32>
    tpu.vector_store %arg9[%c0_15, %c0_16], %24 {strides = array<i32>} : memref<2x32xf32, #tpu.memory_space<vmem>>, vector<2x32xf32>,
    return
  }
  func.func @transform_0(%arg0: i32, %arg1: i32) -> (i32, i32) {
    %c0_i32 = arith.constant 0 : i32
    %c0_i32_0 = arith.constant 0 : i32
    return %arg1, %c0_i32 : i32, i32
  }
  func.func @transform_1(%arg0: i32, %arg1: i32) -> (i32, i32) {
    %c0_i32 = arith.constant 0 : i32
    %c0_i32_0 = arith.constant 0 : i32
    return %arg1, %c0_i32 : i32, i32
  }
  func.func @transform_2(%arg0: i32, %arg1: i32) -> (i32, i32) {
    %c0_i32 = arith.constant 0 : i32
    return %arg1, %arg0 : i32, i32
  }
  func.func @transform_3(%arg0: i32, %arg1: i32) -> (i32, i32) {
    %c0_i32 = arith.constant 0 : i32
    %c0_i32_0 = arith.constant 0 : i32
    return %c0_i32, %arg0 : i32, i32
  }
  func.func @transform_4(%arg0: i32, %arg1: i32) -> (i32, i32) {
    %c0_i32 = arith.constant 0 : i32
    %c0_i32_0 = arith.constant 0 : i32
    return %c0_i32, %arg0 : i32, i32
  }
  func.func @transform_5(%arg0: i32, %arg1: i32) -> (i32, i32) {
    %c0_i32 = arith.constant 0 : i32
    %c0_i32_0 = arith.constant 0 : i32
    return %c0_i32, %arg0 : i32, i32
  }
  func.func @transform_6(%arg0: i32, %arg1: i32) -> (i32, i32) {
    %c0_i32 = arith.constant 0 : i32
    return %arg1, %arg0 : i32, i32
  }
  func.func @transform_7(%arg0: i32, %arg1: i32) -> (i32, i32) {
    %c0_i32 = arith.constant 0 : i32
    return %arg1, %arg0 : i32, i32
  }
}

</mosaic_0001>

<bundles_post_ra>
// kernel: lstm_cell_packed.1
= control target key start
LH: loop header
LB: loop body
LE: loop exit
PB: predicated region body
PF: predicated region fallthrough
CT: control target
= control target key end

     0   :  { %13 = vsyncpa [#allocation3], 0  ;;  %s1649_s0 = inlined_call_operand.hbm [shape: f32[2,16], index: 0, kind: input, shape index: {}]   ;;  %s1650_s1 = inlined_call_operand.vmem [shape: f32[2,32], index: 1, kind: input, shape index: {}]   ;;  %s1651_s2 = inlined_call_operand.vmem [shape: f32[2,32], index: 2, kind: input, shape index: {}]   ;;  %s1652_s3 = inlined_call_operand.hbm [shape: f32[16,128], index: 3, kind: input, shape index: {}]   ;;  %s1653_s4 = inlined_call_operand.hbm [shape: f32[32,128], index: 4, kind: input, shape index: {}]   ;;  %s1654_s5 = inlined_call_operand.vmem [shape: f32[1,128], index: 5, kind: input, shape index: {}]   ;;  %s1655_s6 = inlined_call_operand.hbm [shape: f32[2,32], index: 6, kind: output, shape index: {0}]   ;;  %s1656_s7 = inlined_call_operand.hbm [shape: f32[2,32], index: 7, kind: output, shape index: {1}]  }
   0x1   :  { %14 = vsyncpa [#allocation6], 0 }
   0x2   :  { %15 = vsyncpa [#allocation4], 0 }
   0x3   :  { %16 = vsyncpa [#allocation10], 0  ;;  %s1455_s24 = smov [#allocation5]   ;;  %s1337_s28 = scalar_lea.hbm %s1652_s3, 256 }
   0x4   :  { %s36_s25 = sshll.u32 %s1455_s24, 4  ;;  %p1338_p0 = scmp.ne.s32.totalorder %s1652_s3, %s1337_s28  ;;  %s37_s25 = int_to_ptr.vmem [resolvable:$true] %s36_s25 }
   0x5   :  { %p1341_p1 = scmp.lt.u32.totalorder %s1337_s28, %s1652_s3 }
   0x7   :  { %p1343_p2 = pnand %p1341_p1, %p1338_p0 }
   0x9   :  { %1346 = shalt.err (!%p1343_p2)
}
   0xa   :  { %s1347_s10 = scalar_lea.vmem %s37_s25, 256  ;;  %p1352_p4 = scmp.lt.s32.totalorder %s37_s25, %s37_s25 }
   0xb   :  { %p1348_p3 = scmp.ne.s32.totalorder %s37_s25, %s1347_s10  ;;  %p1353_p5 = scmp.lt.s32.totalorder %s1347_s10, %s1347_s10 }
   0xd   :  { %p1354_p6 = por %p1353_p5, %p1352_p4 }
   0xf   :  { %p1355_p7 = pnand %p1354_p6, %p1348_p3 }
  0x11   :  { %1358 = shalt.err (!%p1355_p7)
}
  0x12   :  { %s1456_s11 = smov 128   ;;  %s1457_s12 = smov 8  }
  0x13   :  { %42 = dma.hbm_to_vmem [thread:$0]  %s1652_s3, 256, %s37_s25, [#allocation6], %s1456_s11, %s1456_s11, %s1457_s12  }
  0x14   :  { %s1458_s15 = smov [#allocation2]   ;;  %s1459_s17 = smov [#allocation7]  }
  0x15   :  { %s23_s16 = sshll.u32 %s1458_s15, 4  ;;  %s48_s18 = sshll.u32 %s1459_s17, 4  ;;  %s24_s16 = int_to_ptr.vmem [resolvable:$true] %s23_s16  ;;  %s49_s18 = int_to_ptr.vmem [resolvable:$true] %s48_s18 }
  0x16   :  { %s1359_s21 = scalar_lea.hbm %s1649_s0, 32 }
  0x17   :  { %p1360_p8 = scmp.ne.s32.totalorder %s1649_s0, %s1359_s21  ;;  %p1363_p9 = scmp.lt.u32.totalorder %s1359_s21, %s1649_s0 }
  0x19   :  { %p1365_p10 = pnand %p1363_p9, %p1360_p8 }
  0x1b   :  { %1368 = shalt.err (!%p1365_p10)
}
  0x1c   :  { %s1369_s3 = scalar_lea.vmem %s24_s16, 32  ;;  %p1374_p12 = scmp.lt.s32.totalorder %s24_s16, %s24_s16 }
  0x1d   :  { %p1370_p11 = scmp.ne.s32.totalorder %s24_s16, %s1369_s3  ;;  %p1375_p13 = scmp.lt.s32.totalorder %s1369_s3, %s1369_s3 }
  0x1f   :  { %p1376_p0 = por %p1375_p13, %p1374_p12 }
  0x21   :  { %p1377_p1 = pnand %p1376_p0, %p1370_p11 }
  0x23   :  { %1380 = shalt.err (!%p1377_p1)
}
  0x24   :  { %26 = dma.hbm_to_vmem [thread:$0]  %s1649_s0, 32, %s24_s16, [#allocation3]  }
  0x25   :  { %s1381_s30 = scalar_lea.hbm %s1653_s4, 512 }
  0x26   :  { %p1382_p2 = scmp.ne.s32.totalorder %s1653_s4, %s1381_s30  ;;  %p1385_p3 = scmp.lt.u32.totalorder %s1381_s30, %s1653_s4 }
  0x28   :  { %p1387_p4 = pnand %p1385_p3, %p1382_p2 }
  0x2a   :  { %1390 = shalt.err (!%p1387_p4)
}
  0x2b   :  { %s1391_s14 = scalar_lea.vmem %s49_s18, 512  ;;  %p1396_p6 = scmp.lt.s32.totalorder %s49_s18, %s49_s18 }
  0x2c   :  { %p1392_p5 = scmp.ne.s32.totalorder %s49_s18, %s1391_s14  ;;  %p1397_p7 = scmp.lt.s32.totalorder %s1391_s14, %s1391_s14 }
  0x2e   :  { %p1398_p8 = por %p1397_p7, %p1396_p6 }
  0x30   :  { %p1399_p9 = pnand %p1398_p8, %p1392_p5 }
  0x32   :  { %1402 = shalt.err (!%p1399_p9)
}
  0x33   :  { %54 = dma.hbm_to_vmem [thread:$0]  %s1653_s4, 512, %s49_s18, [#allocation6], %s1456_s11, %s1456_s11, %s1457_s12  }
  0x34   :  { %1447 = dma.done.wait [#allocation3], 32  }
  0x35   :  { %1448 = vsyncadd [#allocation3], 4294967264 }
  0x36   :  { %1449 = dma.done.wait [#allocation6], 768  }
  0x37   :  { %1450 = vsyncadd [#allocation6], 4294966528  ;;  %v1460_v0 = vmov 0.0|0.0   ;;  %vm1461_vm0 = vmmov 0   ;;  %v1462_v1 = vmov 0.0   ;;  %vm74_vm1 = vcmask 261120  }
  0x38   :  { %1262 = vmatprep.subr.bf16.mxu0 %v1460_v0  ;;  %1268 = vmatprep.subr.bf16.mxu1 %v1460_v0  ;;  %v70_v2 = vld [vmem:[#allocation7] sm:$0xff]  ;;  %v71_v3 = vld [vmem:[#allocation7 + $0x8] sm:$0xff]  ;;  %v72_v4 = vld [vmem:[#allocation7 + $0x10] sm:$0xff]  ;;  %vm563_vm2 = vcmask 130048   ;;  %s1463_s16 = smov 32   ;;  %vm1067_vm3 = vcmask 254976  }
  0x39   :  { %1162 = vmatprep.mubr.msk.f32.mxu0 %vm1461_vm0, %v1462_v1  ;;  %1173 = vmatprep.mubr.msk.f32.mxu1 %vm1461_vm0, %v1462_v1  ;;  %v79_v5 = vand.u32 4294901760, %v70_v2  ;;  %v82_v6 = vand.u32 4294901760, %v71_v3  ;;  %v73_v7 = vld [vmem:[#allocation7 + $0x18] sm:$0xff]  ;;  %v85_v8 = vand.u32 4294901760, %v72_v4  ;;  %v69_v9 = vld [vmem:[%s1650_s1] sm:$0x3] }
  0x3a   :  { %v88_v10 = vand.u32 4294901760, %v73_v7  ;;  %v76_v11 = vsel %vm74_vm1, %v69_v9, 0  ;;  %v66_v29 = vld [vmem:[#allocation2] sm:$0x3]  ;;  %v67_v35 = vld [vmem:[#allocation5] sm:$0xff]  ;;  %v68_v36 = vld [vmem:[#allocation5 + $0x8] sm:$0xff] }
  0x3b   :  { %v1559_v12 = vpack.c.bf16 %v82_v6, %v79_v5  ;;  %v159_v13 = vsub.f32 %v70_v2, %v79_v5  ;;  %v166_v14 = vsub.f32 %v71_v3, %v82_v6  ;;  %v173_v15 = vsub.f32 %v72_v4, %v85_v8  ;;  %s1466_s20 = smov 64  }
  0x3c   :  { %v180_v16 = vsub.f32 %v73_v7, %v88_v10  ;;  %v1561_v17 = vand.u32 4294901760, %v76_v11  ;;  %v1564_v18 = vpack.c.bf16 %v88_v10, %v85_v8  ;;  %v565_v39 = vsel %vm563_vm2, %v66_v29, 0 }
  0x3d   :  { %1264 = vmatpush3.bf16.msra.mxu0 %v1559_v12  ;;  %v160_v19 = vand.u32 4294901760, %v159_v13  ;;  %v167_v20 = vand.u32 4294901760, %v166_v14  ;;  %v174_v21 = vand.u32 4294901760, %v173_v15  ;;  %v1275_v38 = vpack.c.bf16 %v166_v14, %v159_v13 }
  0x3e   :  { %1265 = vmatprep.subr.bf16.mxu0 %v1460_v0  ;;  %v148_v22 = vsub.f32 %v76_v11, %v1561_v17  ;;  %v181_v23 = vand.u32 4294901760, %v180_v16  ;;  %v568_v42 = vand.u32 4294901760, %v67_v35  ;;  %v571_v43 = vand.u32 4294901760, %v68_v36 }
  0x3f   :  { %v161_v24 = vsub.f32 %v159_v13, %v160_v19  ;;  %v168_v25 = vsub.f32 %v166_v14, %v167_v20  ;;  %v175_v26 = vsub.f32 %v173_v15, %v174_v21  ;;  %v1571_v44 = vand.u32 4294901760, %v565_v39 }
  0x40   :  { %v149_v27 = vand.u32 4294901760, %v148_v22  ;;  %v182_v28 = vsub.f32 %v180_v16, %v181_v23  ;;  %v1278_v45 = vpack.c.bf16 %v180_v16, %v173_v15  ;;  %v646_v46 = vsub.f32 %v67_v35, %v568_v42 }
  0x41   :  { %1267 = vmatpush3.bf16.msra.mxu0 %v1564_v18  ;;  %v162_v30 = vand.u32 4294901760, %v161_v24  ;;  %v169_v31 = vand.u32 4294901760, %v168_v25  ;;  %v176_v32 = vand.u32 4294901760, %v175_v26  ;;  %v653_v47 = vsub.f32 %v68_v36, %v571_v43 }
  0x42   :  { %1274 = vmatprep.subr.bf16.mxu0 %v1460_v0  ;;  %v150_v33 = vsub.f32 %v148_v22, %v149_v27  ;;  %v183_v34 = vand.u32 4294901760, %v182_v28  ;;  %v635_v48 = vsub.f32 %v565_v39, %v1571_v44  ;;  %v1287_v49 = vpack.c.bf16 %v167_v20, %v160_v19 }
  0x43   :  { %v1269_v37 = vpack.c.bf16 %v169_v31, %v162_v30  ;;  %v647_v50 = vand.u32 4294901760, %v646_v46  ;;  %v654_v51 = vand.u32 4294901760, %v653_v47  ;;  %v1290_v53 = vpack.c.bf16 %v181_v23, %v174_v21 }
  0x44   :  { %v151_v40 = vand.u32 4294901760, %v150_v33  ;;  %v1272_v41 = vpack.c.bf16 %v183_v34, %v176_v32  ;;  %v636_v52 = vand.u32 4294901760, %v635_v48  ;;  %v1299_v57 = vpack.c.bf16 %v571_v43, %v568_v42  ;;  %v1104_v33 = vld [vmem:[%s1654_s5] ss:$0 sm:$0xff]  ;;  %s1464_s5 = smov 96  }
  0x45   :  { %1270 = vmatpush3.bf16.msra.mxu1 %v1269_v37  ;;  %v648_v54 = vsub.f32 %v646_v46, %v647_v50  ;;  %v655_v55 = vsub.f32 %v653_v47, %v654_v51  ;;  %v1305_v61 = vpack.c.bf16 %v653_v47, %v646_v46  ;;  %v1311_v63 = vpack.c.bf16 %v654_v51, %v647_v50 }
  0x46   :  { %1163 = vmatmul.mubr.f32.vlgmr.msra.gmra.mrb[0].mxu0 %v151_v40  ;;  %1271 = vmatprep.subr.bf16.mxu1 %v1460_v0  ;;  %v637_v56 = vsub.f32 %v635_v48, %v636_v52 }
  0x47   :  { %1276 = vmatpush3.bf16.msra.mxu0 %v1275_v38  ;;  %1184 = vmatprep.mubr.msk.f32.mxu0 %vm1461_vm0, %v1462_v1  ;;  %v649_v58 = vand.u32 4294901760, %v648_v54  ;;  %v656_v59 = vand.u32 4294901760, %v655_v55  ;;  %v1041_v38 = vld [vmem:[%s1651_s2] sm:$0x3]  ;;  %s1465_s2 = smov [#allocation9]  }
  0x48   :  { %1277 = vmatprep.subr.bf16.mxu0 %v1460_v0  ;;  %v638_v60 = vand.u32 4294901760, %v637_v56  ;;  %s1090_s19 = sshll.u32 %s1465_s2, 4  ;;  %s1091_s19 = int_to_ptr.vmem [resolvable:$true] %s1090_s19 }
  0x49   :  { %1273 = vmatpush3.bf16.msra.mxu1 %v1272_v41  ;;  %v1302_v62 = vpack.c.bf16 %v656_v59, %v649_v58  ;;  %s1403_s21 = scalar_lea.vmem %s1091_s19, 32  ;;  %p1408_p11 = scmp.lt.s32.totalorder %s1091_s19, %s1091_s19 }
  0x4a   :  { %1280 = vmatprep.subr.bf16.mxu1 %v1460_v0  ;;  %p1404_p10 = scmp.ne.s32.totalorder %s1091_s19, %s1403_s21  ;;  %p1409_p12 = scmp.lt.s32.totalorder %s1403_s21, %s1403_s21 }
  0x4b   :  { %1279 = vmatpush3.bf16.msra.mxu0 %v1278_v45 }
  0x4c   :  { %1174 = vmatmul.mubr.f32.vlgmr.msra.gmra.mrb[0].mxu1 %v1561_v17  ;;  %1286 = vmatprep.subr.bf16.mxu0 %v1460_v0  ;;  %p1410_p13 = por %p1409_p12, %p1408_p11 }
  0x4d   :  { %1282 = vmatpush3.bf16.msra.mxu1 %v1559_v12  ;;  %1195 = vmatprep.mubr.msk.f32.mxu1 %vm1461_vm0, %v1462_v1 }
  0x4e   :  { %1185 = vmatmul.mubr.f32.vlgmr.msra.gmra.mrb[2].mxu0 %v148_v22  ;;  %1283 = vmatprep.subr.bf16.mxu1 %v1460_v0  ;;  %p1411_p0 = pnand %p1410_p13, %p1404_p10 }
  0x4f   :  { %1288 = vmatpush3.bf16.msra.mxu0 %v1287_v49  ;;  %1206 = vmatprep.mubr.msk.f32.mxu0 %vm1461_vm0, %v1462_v1 }
  0x50   :  { %1289 = vmatprep.subr.bf16.mxu0 %v1460_v0 }
  0x51   :  { %1285 = vmatpush3.bf16.msra.mxu1 %v1564_v18 }
  0x52   :  { %1292 = vmatprep.subr.bf16.mxu1 %v1460_v0 }
  0x53   :  { %1291 = vmatpush3.bf16.msra.mxu0 %v1290_v53 }
  0x54   :  { %1196 = vmatmul.mubr.f32.vlgmr.msra.gmra.mrb[2].mxu1 %v149_v27  ;;  %1298 = vmatprep.subr.bf16.mxu0 %v1460_v0 }
  0x55   :  { %1294 = vmatpush3.bf16.msra.mxu1 %v1559_v12  ;;  %1217 = vmatprep.mubr.msk.f32.mxu1 %vm1461_vm0, %v1462_v1 }
  0x56   :  { %1207 = vmatmul.mubr.f32.vlgmr.msra.gmra.mrb[4].mxu0 %v1561_v17  ;;  %1295 = vmatprep.subr.bf16.mxu1 %v1460_v0 }
  0x57   :  { %1300 = vmatpush3.bf16.msra.mxu0 %v1299_v57  ;;  %1224 = vmatprep.mubr.msk.f32.mxu0 %vm1461_vm0, %v1462_v1 }
  0x58   :  { %1304 = vmatprep.subr.bf16.mxu0 %v1460_v0 }
  0x59   :  { %1297 = vmatpush3.bf16.msra.mxu1 %v1564_v18 }
  0x5a   :  { %1301 = vmatprep.subr.bf16.mxu1 %v1460_v0  ;;  %1225 = vmatmul.mubr.f32.vlgmr.msra.gmra.mrb[6].mxu0 %v638_v60 }
  0x5b   :  { %1306 = vmatpush3.bf16.msra.mxu0 %v1305_v61  ;;  %1238 = vmatprep.mubr.msk.f32.mxu0 %vm1461_vm0, %v1462_v1 }
  0x5c   :  { %1218 = vmatmul.mubr.f32.vlgmr.msra.gmra.mrb[4].mxu1 %v1561_v17  ;;  %1310 = vmatprep.subr.bf16.mxu0 %v1460_v0 }
  0x5d   :  { %1303 = vmatpush3.bf16.msra.mxu1 %v1302_v62  ;;  %1231 = vmatprep.mubr.msk.f32.mxu1 %vm1461_vm0, %v1462_v1 }
  0x5e   :  { %1307 = vmatprep.subr.bf16.mxu1 %v1460_v0  ;;  %1239 = vmatmul.mubr.f32.vlgmr.msra.gmra.mrb[8].mxu0 %v635_v48 }
  0x5f   :  { %1312 = vmatpush3.bf16.msra.mxu0 %v1311_v63  ;;  %1252 = vmatprep.mubr.msk.f32.mxu0 %vm1461_vm0, %v1462_v1 }
  0x60   :  { %1232 = vmatmul.mubr.f32.vlgmr.msra.gmra.mrb[6].mxu1 %v1571_v44 }
  0x61   :  { %1309 = vmatpush3.bf16.msra.mxu1 %v1299_v57  ;;  %1245 = vmatprep.mubr.msk.f32.mxu1 %vm1461_vm0, %v1462_v1 }
  0x62   :  { %1313 = vmatprep.subr.bf16.mxu1 %v1460_v0  ;;  %1253 = vmatmul.mubr.f32.vlgmr.msra.gmra.mrb[10].mxu0 %v1571_v44 }
  0x64   :  { %1246 = vmatmul.mubr.f32.vlgmr.msra.gmra.mrb[8].mxu1 %v636_v52 }
  0x65   :  { %1315 = vmatpush3.bf16.msra.mxu1 %v1299_v57  ;;  %1259 = vmatprep.mubr.msk.f32.mxu1 %vm1461_vm0, %v1462_v1 }
  0x68   :  { %1260 = vmatmul.mubr.f32.vlgmr.msra.gmra.mrb[10].mxu1 %v1571_v44 }
 0x119   :  { %v153_v2 = vpop.f32.mrb[0].mxu0 }
 0x11a   :  { %v1164_v3 = vpop.f32.mrb[1].mxu0 }
 0x11f   :  { %v244_v4 = vpop.f32.mrb[0].mxu1 }
 0x120   :  { %v245_v5 = vadd.f32 %v244_v4, %v153_v2  ;;  %v1175_v6 = vpop.f32.mrb[1].mxu1 }
 0x121   :  { %v324_v7 = vpop.f32.mrb[2].mxu0 }
 0x122   :  { %v325_v8 = vadd.f32 %v324_v7, %v245_v5  ;;  %v1186_v9 = vpop.f32.mrb[3].mxu0 }
 0x127   :  { %v401_v10 = vpop.f32.mrb[2].mxu1 }
 0x128   :  { %v402_v11 = vadd.f32 %v401_v10, %v325_v8  ;;  %v1197_v0 = vpop.f32.mrb[3].mxu1 }
 0x129   :  { %v484_v12 = vpop.f32.mrb[4].mxu0 }
 0x12a   :  { %v485_v13 = vadd.f32 %v484_v12, %v402_v11  ;;  %v1208_v14 = vpop.f32.mrb[5].mxu0 }
 0x12d   :  { %v640_v15 = vpop.f32.mrb[6].mxu0 }
 0x12e   :  { %v1226_v16 = vpop.f32.mrb[7].mxu0 }
 0x12f   :  { %v559_v17 = vpop.f32.mrb[4].mxu1 }
 0x130   :  { %v560_v1 = vadd.f32 %v559_v17, %v485_v13  ;;  %v1219_v18 = vpop.f32.mrb[5].mxu1 }
 0x131   :  { %v797_v19 = vpop.f32.mrb[8].mxu0 }
 0x132   :  { %v641_v20 = vadd.f32 %v640_v15, %v560_v1  ;;  %v1240_v21 = vpop.f32.mrb[9].mxu0 }
 0x133   :  { %v721_v22 = vpop.f32.mrb[6].mxu1 }
 0x134   :  { %v722_v23 = vadd.f32 %v721_v22, %v641_v20  ;;  %v1233_v24 = vpop.f32.mrb[7].mxu1 }
 0x135   :  { %v949_v25 = vpop.f32.mrb[10].mxu0 }
 0x136   :  { %v798_v26 = vadd.f32 %v797_v19, %v722_v23  ;;  %v1254_v27 = vpop.f32.mrb[11].mxu0 }
 0x137   :  { %v872_v28 = vpop.f32.mrb[8].mxu1 }
 0x138   :  { %v873_v29 = vadd.f32 %v872_v28, %v798_v26  ;;  %v1247_v30 = vpop.f32.mrb[9].mxu1 }
 0x13a   :  { %v950_v31 = vadd.f32 %v949_v25, %v873_v29 }
 0x13b   :  { %v1022_v32 = vpop.f32.mrb[10].mxu1 }
 0x13c   :  { %v1023_v34 = vadd.f32 %v1022_v32, %v950_v31  ;;  %v1261_v35 = vpop.f32.mrb[11].mxu1 }
 0x13e   :  { %v1033_v36 = vadd.f32 %v1104_v33, %v1023_v34 }
 0x140   :  { %1329 = vtanh.f32 %v1033_v36  ;;  %v1105_v39 = vmul.f32 -1.442695, %v1033_v36 }
 0x142   :  { %1331 = vpow2.f32 %v1105_v39 }
 0x14a   :  { %v1330_v37 = vpop.eup %1329 }
 0x14b   :  { %1048 = vrot.lane.b32.xlu0 %v1330_v37, %s1463_s16 }
 0x14c   :  { %v1332_v40 = vpop.eup %1331 }
 0x14d   :  { %v1037_v41 = vadd.f32 1.0, %v1332_v40 }
 0x14f   :  { %1043 = vrot.lane.b32.xlu0 %v1041_v38, %s1463_s16  ;;  %1333 = vrcp.f32 %v1037_v41 }
 0x159   :  { %v1334_v42 = vpop.eup %1333 }
 0x1bd   :  { %v1049_v43 = vpop.permute.xlu0 %1048 }
 0x1be   :  { %v1051_v44 = vmul.f32 %v1334_v42, %v1049_v43 }
 0x1c0   :  { %1053 = vrot.lane.b32.xlu1 %v1051_v44, %s1463_s16 }
 0x1c1   :  { %v1044_v45 = vpop.permute.xlu0 %1043 }
 0x1c2   :  { %v1046_v46 = vmul.f32 %v1334_v42, %v1044_v45 }
 0x232   :  { %v1054_v47 = vpop.permute.xlu1 %1053 }
 0x233   :  { %v1056_v48 = vadd.f32 %v1054_v47, %v1046_v46 }
 0x235   :  { %1335 = vtanh.f32 %v1056_v48 }
 0x23f   :  { %v1336_v49 = vpop.eup %1335 }
 0x240   :  { %1059 = vrot.lane.b32.xlu1 %v1336_v49, %s1463_s16 }
 0x244   :  { %1070 = vrot.lane.b32.xlu1 %v1056_v48, %s1464_s5 }
 0x2b2   :  { %v1060_v50 = vpop.permute.xlu1 %1059 }
 0x2b3   :  { %v1062_v51 = vmul.f32 %v1334_v42, %v1060_v50 }
 0x2b5   :  { %1064 = vrot.lane.b32.xlu0 %v1062_v51, %s1466_s20 }
 0x2b6   :  { %v1071_v52 = vpop.permute.xlu1 %1070 }
 0x2b7   :  { %1073 = vst.msk [vmem:[#allocation9] sm:$0x3] %vm1067_vm3, %v1071_v52 }
 0x2b8   :  { %1414 = shalt.err (!%p1411_p0)
}
 0x2b9   :  { %s1415_s24 = scalar_lea.hbm %s1656_s7, 32 }
 0x2ba   :  { %p1416_p1 = scmp.ne.s32.totalorder %s1656_s7, %s1415_s24  ;;  %p1419_p2 = scmp.lt.u32.totalorder %s1415_s24, %s1656_s7 }
 0x2bc   :  { %p1421_p3 = pnand %p1419_p2, %p1416_p1 }
 0x2be   :  { %1424 = shalt.err (!%p1421_p3)
}
 0x2bf   :  { %1093 = dma.vmem_to_hbm [thread:$0]  %s1091_s19, 32, %s1656_s7, [#allocation10]  }
 0x2c0   :  { %s1467_s30 = smov [#allocation8]  }
 0x2c1   :  { %s1080_s8 = sshll.u32 %s1467_s30, 4  ;;  %s1081_s8 = int_to_ptr.vmem [resolvable:$true] %s1080_s8 }
 0x2c2   :  { %s1425_s9 = scalar_lea.vmem %s1081_s8, 32  ;;  %p1430_p5 = scmp.lt.s32.totalorder %s1081_s8, %s1081_s8 }
 0x2c3   :  { %p1426_p4 = scmp.ne.s32.totalorder %s1081_s8, %s1425_s9  ;;  %p1431_p6 = scmp.lt.s32.totalorder %s1425_s9, %s1425_s9 }
 0x2c5   :  { %p1432_p7 = por %p1431_p6, %p1430_p5 }
 0x2c7   :  { %p1433_p8 = pnand %p1432_p7, %p1426_p4 }
 0x327   :  { %v1065_v53 = vpop.permute.xlu0 %1064 }
 0x328   :  { %1068 = vst.msk [vmem:[#allocation8] sm:$0x3] %vm1067_vm3, %v1065_v53 }
 0x329   :  { %1436 = shalt.err (!%p1433_p8)
}
 0x32a   :  { %s1437_s14 = scalar_lea.hbm %s1655_s6, 32 }
 0x32b   :  { %p1438_p9 = scmp.ne.s32.totalorder %s1655_s6, %s1437_s14  ;;  %p1441_p10 = scmp.lt.u32.totalorder %s1437_s14, %s1655_s6 }
 0x32d   :  { %p1443_p11 = pnand %p1441_p10, %p1438_p9 }
 0x32f   :  { %1446 = shalt.err (!%p1443_p11)
}
 0x330   :  { %1083 = dma.vmem_to_hbm [thread:$0]  %s1081_s8, 32, %s1655_s6, [#allocation4]  }
 0x331   :  { %1451 = dma.done.wait [#allocation4], 32  }
 0x332   :  { %1452 = vsyncadd [#allocation4], 4294967264 }
 0x333   :  { %1453 = dma.done.wait [#allocation10], 32  }
 0x334   :  { %1454 = vsyncadd [#allocation10], 4294967264 }
 0x335   :  { %1100 = vsyncpa [#allocation3], 1 }
 0x336   :  { %1101 = vsyncpa [#allocation6], 1 }
 0x337   :  { %1102 = vsyncpa [#allocation4], 1 }
 0x338   :  { %1103 = vsyncpa [#allocation10], 1 }

</bundles_post_ra>
